<compile_context>
chip_gen: v7x
topology: tpu7x:2x2x1
jax: 0.10.0
libtpu: 0.0.40
codegen_flags: <defaults>
</compile_context>

<pallas_src>
import jax
import jax.numpy as jnp
from jax.experimental import pallas as pl
from jax.experimental.pallas import tpu as pltpu

LANE = 128            # batch-tile granularity (lane width)
IN_DIM = 4
H1, H2, H3 = 128, 64, 32
OUT_DIM = 3
OUT_PAD = 8           # output rows padded 3 -> 8 (f32 sublane granularity)
DEFAULT_TILE_B = 4096


def _round_up(n, m):
    return ((n + m - 1) // m) * m


def irisnet_kernel(x_ref,
                   w1_ref, b1_ref,
                   w2_ref, b2_ref,
                   w3_ref, b3_ref,
                   w4_ref, b4_ref,
                   out_ref):
    # x_ref: [4, TB] f32 (transposed input tile)

    # ---- layer 1 (K=4): four outer-product FMAs on the VPU, skip the MXU ----
    h = w1_ref[:, 0:1] * x_ref[0:1, :]                 # [128,1]*[1,TB] -> [128,TB]
    for k in range(1, IN_DIM):
        h = h + w1_ref[:, k:k + 1] * x_ref[k:k + 1, :]
    h = jnp.maximum(h + b1_ref[...], 0.0)              # [128, TB] f32

    # ---- layers 2-4: f32 MXU matmuls, weights as LHS (feature-major) ----
    h = jnp.maximum(
        jnp.dot(w2_ref[...], h, preferred_element_type=jnp.float32)
        + b2_ref[...], 0.0)                            # [64, TB]
    h = jnp.maximum(
        jnp.dot(w3_ref[...], h, preferred_element_type=jnp.float32)
        + b3_ref[...], 0.0)                            # [32, TB]
    out_ref[...] = (
        jnp.dot(w4_ref[...], h, preferred_element_type=jnp.float32)
        + b4_ref[...])                                 # [8, TB]  (rows 3..7 == 0)


def pack_params(params):
    """Transpose every layer to [out, in] (feature-major); pad only layer 4's
    output dim 3 -> 8 with exact zeros.  Everything stays f32."""
    w1t = params["w1"].T.astype(jnp.float32)                       # [128, 4]
    b1t = params["b1"].T.astype(jnp.float32)                       # [128, 1]
    w2t = params["w2"].T.astype(jnp.float32)                       # [64, 128]
    b2t = params["b2"].T.astype(jnp.float32)                       # [64, 1]
    w3t = params["w3"].T.astype(jnp.float32)                       # [32, 64]
    b3t = params["b3"].T.astype(jnp.float32)                       # [32, 1]
    w4t = jnp.pad(params["w4"].T, ((0, OUT_PAD - OUT_DIM), (0, 0))
                  ).astype(jnp.float32)                            # [8, 32]
    b4t = jnp.pad(params["b4"].T, ((0, OUT_PAD - OUT_DIM), (0, 0))
                  ).astype(jnp.float32)                            # [8, 1]
    return (w1t, b1t, w2t, b2t, w3t, b3t, w4t, b4t)


def irisnet_forward(x, packed_params, tile_b=DEFAULT_TILE_B):
    """x: [B, 4] float32; packed_params: output of pack_params. Returns [B, 3] f32."""
    B = x.shape[0]
    xT = x.astype(jnp.float32).T                    # [4, B]

    tb = max(LANE, min(_round_up(tile_b, LANE), _round_up(B, LANE)))
    Bp = _round_up(B, tb)
    if Bp != B:
        xT = jnp.pad(xT, ((0, 0), (0, Bp - B)))
    grid = (Bp // tb,)

    def resident(shape):
        # Same block every grid step -> parameter stays VMEM-resident.
        return pl.BlockSpec(shape, lambda i: (0, 0))

    in_specs = [
        pl.BlockSpec((IN_DIM, tb), lambda i: (0, i)),   # xT: streamed + double-buffered
        resident((H1, IN_DIM)), resident((H1, 1)),      # w1T, b1T
        resident((H2, H1)),     resident((H2, 1)),      # w2T, b2T
        resident((H3, H2)),     resident((H3, 1)),      # w3T, b3T
        resident((OUT_PAD, H3)), resident((OUT_PAD, 1)),  # w4T, b4T (zero-padded rows)
    ]

    out = pl.pallas_call(
        irisnet_kernel,
        out_shape=jax.ShapeDtypeStruct((OUT_PAD, Bp), jnp.float32),
        grid=grid,
        in_specs=in_specs,
        out_specs=pl.BlockSpec((OUT_PAD, tb), lambda i: (0, i)),
        compiler_params=pltpu.CompilerParams(
            dimension_semantics=("parallel",)),         # shard batch grid across TCs
    )(xT, *packed_params)

    return out[:OUT_DIM, :B].T                          # [B, 3]


def init_params(key):
    """Deterministic init matching nn.Linear shapes (stored as [in, out])."""
    dims = [(4, 128), (128, 64), (64, 32), (32, 3)]
    params = {}
    keys = jax.random.split(key, len(dims) * 2)
    for i, (fan_in, fan_out) in enumerate(dims):
        kw, kb = keys[2 * i], keys[2 * i + 1]
        bound = 1.0 / (fan_in ** 0.5)  # PyTorch default nn.Linear init range
        params[f"w{i + 1}"] = jax.random.uniform(
            kw, (fan_in, fan_out), jnp.float32, minval=-bound, maxval=bound)
        params[f"b{i + 1}"] = jax.random.uniform(
            kb, (1, fan_out), jnp.float32, minval=-bound, maxval=bound)
    return params


def reference_forward(x, params):
    """Pure-JAX f32 reference of the PyTorch module semantics."""
    h = jnp.maximum(x @ params["w1"] + params["b1"], 0.0)
    h = jnp.maximum(h @ params["w2"] + params["b2"], 0.0)
    h = jnp.maximum(h @ params["w3"] + params["b3"], 0.0)
    return h @ params["w4"] + params["b4"]


if __name__ == "__main__":
    key = jax.random.PRNGKey(0)
    kx, kp = jax.random.split(key)

    params = init_params(kp)
    packed = pack_params(params)

    # Tolerance note: kernel and reference both run f32 matmuls at TPU default
    # MXU precision but with opposite contraction orientation, so tiny
    # (~1e-3-level) rounding differences are expected; 5e-3 covers it with margin.
    ATOL = RTOL = 5e-3

    # Case 1: multi-step batch grid (200 rows, tile 128 -> padded to 256, 2 steps).
    B1 = 200
    x1 = jax.random.normal(kx, (B1, 4), dtype=jnp.float32)
    out1 = jax.block_until_ready(irisnet_forward(x1, packed, tile_b=128))
    ref1 = reference_forward(x1, params)
    assert out1.shape == (B1, 3), out1.shape
    assert jnp.allclose(out1, ref1, atol=ATOL, rtol=RTOL), \
        float(jnp.max(jnp.abs(out1 - ref1)))

    # Case 2: tiny batch (single tile), default tile size.
    B2 = 8
    x2 = jax.random.normal(jax.random.PRNGKey(1), (B2, 4), dtype=jnp.float32)
    out2 = jax.block_until_ready(irisnet_forward(x2, packed))
    ref2 = reference_forward(x2, params)
    assert out2.shape == (B2, 3), out2.shape
    assert jnp.allclose(out2, ref2, atol=ATOL, rtol=RTOL), \
        float(jnp.max(jnp.abs(out2 - ref2)))

    print("KERNEL_OK")
</pallas_src>

<mosaic_0001>
module attributes {stable_mosaic.version = 11 : i64} {
  func.func @irisnet_kernel(%arg0: i32, %arg1: memref<4x128xf32, #tpu.memory_space<vmem>>, %arg2: memref<128x4xf32, #tpu.memory_space<vmem>>, %arg3: memref<128x1xf32, #tpu.memory_space<vmem>>, %arg4: memref<64x128xf32, #tpu.memory_space<vmem>>, %arg5: memref<64x1xf32, #tpu.memory_space<vmem>>, %arg6: memref<32x64xf32, #tpu.memory_space<vmem>>, %arg7: memref<32x1xf32, #tpu.memory_space<vmem>>, %arg8: memref<8x32xf32, #tpu.memory_space<vmem>>, %arg9: memref<8x1xf32, #tpu.memory_space<vmem>>, %arg10: memref<8x128xf32, #tpu.memory_space<vmem>>) attributes {dimension_semantics = [#tpu.dimension_semantics<parallel>], iteration_bounds = array<i64: 2>, scalar_prefetch = 0 : i64, scratch_operands = 0 : i64, tpu.core_type = #tpu.core_type<tc>, window_params = [{transform_indices = @transform_0, window_bounds = array<i64: 4, 128>}, {pipeline_mode = #tpu.pipeline_mode<synchronous>, transform_indices = @transform_1, window_bounds = array<i64: 128, 4>}, {pipeline_mode = #tpu.pipeline_mode<synchronous>, transform_indices = @transform_2, window_bounds = array<i64: 128, 1>}, {pipeline_mode = #tpu.pipeline_mode<synchronous>, transform_indices = @transform_3, window_bounds = array<i64: 64, 128>}, {pipeline_mode = #tpu.pipeline_mode<synchronous>, transform_indices = @transform_4, window_bounds = array<i64: 64, 1>}, {pipeline_mode = #tpu.pipeline_mode<synchronous>, transform_indices = @transform_5, window_bounds = array<i64: 32, 64>}, {pipeline_mode = #tpu.pipeline_mode<synchronous>, transform_indices = @transform_6, window_bounds = array<i64: 32, 1>}, {pipeline_mode = #tpu.pipeline_mode<synchronous>, transform_indices = @transform_7, window_bounds = array<i64: 8, 32>}, {pipeline_mode = #tpu.pipeline_mode<synchronous>, transform_indices = @transform_8, window_bounds = array<i64: 8, 1>}, {transform_indices = @transform_9, window_bounds = array<i64: 8, 128>}]} {
    %c0 = arith.constant 0 : index
    %c0_0 = arith.constant 0 : index
    %0 = vector.load %arg2[%c0, %c0_0] : memref<128x4xf32, #tpu.memory_space<vmem>>, vector<128x1xf32>
    %c0_1 = arith.constant 0 : index
    %c0_2 = arith.constant 0 : index
    %1 = vector.load %arg1[%c0_1, %c0_2] : memref<4x128xf32, #tpu.memory_space<vmem>>, vector<1x128xf32>
    %2 = vector.broadcast %0 : vector<128x1xf32> to vector<128x128xf32>
    %3 = vector.broadcast %1 : vector<1x128xf32> to vector<128x128xf32>
    %4 = arith.mulf %2, %3 : vector<128x128xf32>
    %c0_3 = arith.constant 0 : index
    %c1 = arith.constant 1 : index
    %5 = vector.load %arg2[%c0_3, %c1] : memref<128x4xf32, #tpu.memory_space<vmem>>, vector<128x1xf32>
    %c1_4 = arith.constant 1 : index
    %c0_5 = arith.constant 0 : index
    %6 = vector.load %arg1[%c1_4, %c0_5] : memref<4x128xf32, #tpu.memory_space<vmem>>, vector<1x128xf32>
    %7 = vector.broadcast %5 : vector<128x1xf32> to vector<128x128xf32>
    %8 = vector.broadcast %6 : vector<1x128xf32> to vector<128x128xf32>
    %9 = arith.mulf %7, %8 : vector<128x128xf32>
    %10 = arith.addf %4, %9 : vector<128x128xf32>
    %c0_6 = arith.constant 0 : index
    %c2 = arith.constant 2 : index
    %11 = vector.load %arg2[%c0_6, %c2] : memref<128x4xf32, #tpu.memory_space<vmem>>, vector<128x1xf32>
    %c2_7 = arith.constant 2 : index
    %c0_8 = arith.constant 0 : index
    %12 = vector.load %arg1[%c2_7, %c0_8] : memref<4x128xf32, #tpu.memory_space<vmem>>, vector<1x128xf32>
    %13 = vector.broadcast %11 : vector<128x1xf32> to vector<128x128xf32>
    %14 = vector.broadcast %12 : vector<1x128xf32> to vector<128x128xf32>
    %15 = arith.mulf %13, %14 : vector<128x128xf32>
    %16 = arith.addf %10, %15 : vector<128x128xf32>
    %c0_9 = arith.constant 0 : index
    %c3 = arith.constant 3 : index
    %17 = vector.load %arg2[%c0_9, %c3] : memref<128x4xf32, #tpu.memory_space<vmem>>, vector<128x1xf32>
    %c3_10 = arith.constant 3 : index
    %c0_11 = arith.constant 0 : index
    %18 = vector.load %arg1[%c3_10, %c0_11] : memref<4x128xf32, #tpu.memory_space<vmem>>, vector<1x128xf32>
    %19 = vector.broadcast %17 : vector<128x1xf32> to vector<128x128xf32>
    %20 = vector.broadcast %18 : vector<1x128xf32> to vector<128x128xf32>
    %21 = arith.mulf %19, %20 : vector<128x128xf32>
    %22 = arith.addf %16, %21 : vector<128x128xf32>
    %c0_12 = arith.constant 0 : index
    %c0_13 = arith.constant 0 : index
    %23 = vector.load %arg3[%c0_12, %c0_13] : memref<128x1xf32, #tpu.memory_space<vmem>>, vector<128x1xf32>
    %24 = vector.broadcast %23 : vector<128x1xf32> to vector<128x128xf32>
    %25 = arith.addf %22, %24 : vector<128x128xf32>
    %cst = arith.constant 0.000000e+00 : f32
    %26 = vector.broadcast %cst : f32 to vector<128x128xf32>
    %27 = arith.maximumf %25, %26 : vector<128x128xf32>
    %c0_14 = arith.constant 0 : index
    %c0_15 = arith.constant 0 : index
    %28 = vector.load %arg4[%c0_14, %c0_15] : memref<64x128xf32, #tpu.memory_space<vmem>>, vector<64x128xf32>
    %cst_16 = arith.constant dense<0.000000e+00> : vector<64x128xf32>
    %29 = tpu.matmul %28, %27, %cst_16 {dimension_numbers = #tpu.dot_dimension_numbers<[1], [0], [0], [1], [0, 0, 1, 1], [], []>} : vector<64x128xf32>, vector<128x128xf32>, vector<64x128xf32> -> vector<64x128xf32>
    %c0_17 = arith.constant 0 : index
    %c0_18 = arith.constant 0 : index
    %30 = vector.load %arg5[%c0_17, %c0_18] : memref<64x1xf32, #tpu.memory_space<vmem>>, vector<64x1xf32>
    %31 = vector.broadcast %30 : vector<64x1xf32> to vector<64x128xf32>
    %32 = arith.addf %29, %31 : vector<64x128xf32>
    %cst_19 = arith.constant 0.000000e+00 : f32
    %33 = vector.broadcast %cst_19 : f32 to vector<64x128xf32>
    %34 = arith.maximumf %32, %33 : vector<64x128xf32>
    %c0_20 = arith.constant 0 : index
    %c0_21 = arith.constant 0 : index
    %35 = vector.load %arg6[%c0_20, %c0_21] : memref<32x64xf32, #tpu.memory_space<vmem>>, vector<32x64xf32>
    %cst_22 = arith.constant dense<0.000000e+00> : vector<32x128xf32>
    %36 = tpu.matmul %35, %34, %cst_22 {dimension_numbers = #tpu.dot_dimension_numbers<[1], [0], [0], [1], [0, 0, 1, 1], [], []>} : vector<32x64xf32>, vector<64x128xf32>, vector<32x128xf32> -> vector<32x128xf32>
    %c0_23 = arith.constant 0 : index
    %c0_24 = arith.constant 0 : index
    %37 = vector.load %arg7[%c0_23, %c0_24] : memref<32x1xf32, #tpu.memory_space<vmem>>, vector<32x1xf32>
    %38 = vector.broadcast %37 : vector<32x1xf32> to vector<32x128xf32>
    %39 = arith.addf %36, %38 : vector<32x128xf32>
    %cst_25 = arith.constant 0.000000e+00 : f32
    %40 = vector.broadcast %cst_25 : f32 to vector<32x128xf32>
    %41 = arith.maximumf %39, %40 : vector<32x128xf32>
    %c0_26 = arith.constant 0 : index
    %c0_27 = arith.constant 0 : index
    %42 = vector.load %arg8[%c0_26, %c0_27] : memref<8x32xf32, #tpu.memory_space<vmem>>, vector<8x32xf32>
    %cst_28 = arith.constant dense<0.000000e+00> : vector<8x128xf32>
    %43 = tpu.matmul %42, %41, %cst_28 {dimension_numbers = #tpu.dot_dimension_numbers<[1], [0], [0], [1], [0, 0, 1, 1], [], []>} : vector<8x32xf32>, vector<32x128xf32>, vector<8x128xf32> -> vector<8x128xf32>
    %c0_29 = arith.constant 0 : index
    %c0_30 = arith.constant 0 : index
    %44 = vector.load %arg9[%c0_29, %c0_30] : memref<8x1xf32, #tpu.memory_space<vmem>>, vector<8x1xf32>
    %45 = vector.broadcast %44 : vector<8x1xf32> to vector<8x128xf32>
    %46 = arith.addf %43, %45 : vector<8x128xf32>
    %c0_31 = arith.constant 0 : index
    %c0_32 = arith.constant 0 : index
    %47 = vector.load %arg10[%c0_31, %c0_32] : memref<8x128xf32, #tpu.memory_space<vmem>>, vector<8x128xf32>
    tpu.vector_store %arg10[%c0_31, %c0_32], %46 {strides = array<i32>} : memref<8x128xf32, #tpu.memory_space<vmem>>, vector<8x128xf32>,
    return
  }
  func.func @transform_0(%arg0: i32) -> (i32, i32) {
    %c0_i32 = arith.constant 0 : i32
    %c0_i32_0 = arith.constant 0 : i32
    return %c0_i32, %arg0 : i32, i32
  }
  func.func @transform_1(%arg0: i32) -> (i32, i32) {
    %c0_i32 = arith.constant 0 : i32
    %c0_i32_0 = arith.constant 0 : i32
    %c0_i32_1 = arith.constant 0 : i32
    return %c0_i32, %c0_i32_0 : i32, i32
  }
  func.func @transform_2(%arg0: i32) -> (i32, i32) {
    %c0_i32 = arith.constant 0 : i32
    %c0_i32_0 = arith.constant 0 : i32
    %c0_i32_1 = arith.constant 0 : i32
    return %c0_i32, %c0_i32_0 : i32, i32
  }
  func.func @transform_3(%arg0: i32) -> (i32, i32) {
    %c0_i32 = arith.constant 0 : i32
    %c0_i32_0 = arith.constant 0 : i32
    %c0_i32_1 = arith.constant 0 : i32
    return %c0_i32, %c0_i32_0 : i32, i32
  }
  func.func @transform_4(%arg0: i32) -> (i32, i32) {
    %c0_i32 = arith.constant 0 : i32
    %c0_i32_0 = arith.constant 0 : i32
    %c0_i32_1 = arith.constant 0 : i32
    return %c0_i32, %c0_i32_0 : i32, i32
  }
  func.func @transform_5(%arg0: i32) -> (i32, i32) {
    %c0_i32 = arith.constant 0 : i32
    %c0_i32_0 = arith.constant 0 : i32
    %c0_i32_1 = arith.constant 0 : i32
    return %c0_i32, %c0_i32_0 : i32, i32
  }
  func.func @transform_6(%arg0: i32) -> (i32, i32) {
    %c0_i32 = arith.constant 0 : i32
    %c0_i32_0 = arith.constant 0 : i32
    %c0_i32_1 = arith.constant 0 : i32
    return %c0_i32, %c0_i32_0 : i32, i32
  }
  func.func @transform_7(%arg0: i32) -> (i32, i32) {
    %c0_i32 = arith.constant 0 : i32
    %c0_i32_0 = arith.constant 0 : i32
    %c0_i32_1 = arith.constant 0 : i32
    return %c0_i32, %c0_i32_0 : i32, i32
  }
  func.func @transform_8(%arg0: i32) -> (i32, i32) {
    %c0_i32 = arith.constant 0 : i32
    %c0_i32_0 = arith.constant 0 : i32
    %c0_i32_1 = arith.constant 0 : i32
    return %c0_i32, %c0_i32_0 : i32, i32
  }
  func.func @transform_9(%arg0: i32) -> (i32, i32) {
    %c0_i32 = arith.constant 0 : i32
    %c0_i32_0 = arith.constant 0 : i32
    return %c0_i32, %arg0 : i32, i32
  }
}

</mosaic_0001>

<bundles_post_ra>
// kernel: tpu_custom_call.1
= control target key start
LH: loop header
LB: loop body
LE: loop exit
PB: predicated region body
PF: predicated region fallthrough
CT: control target
= control target key end

     0   :  { %14 = vsyncpa [#allocation3], 0  ;;  %s2258_s0 = inlined_call_operand.vmem [shape: f32[4,256], index: 0, kind: input, shape index: {}]   ;;  %s2259_s1 = inlined_call_operand.vmem [shape: f32[128,4], index: 1, kind: input, shape index: {}]   ;;  %s2260_s2 = inlined_call_operand.vmem [shape: f32[128,1], index: 2, kind: input, shape index: {}]   ;;  %s2261_s3 = inlined_call_operand.vmem [shape: f32[64,128], index: 3, kind: input, shape index: {}]   ;;  %s2262_s4 = inlined_call_operand.vmem [shape: f32[64,1], index: 4, kind: input, shape index: {}]   ;;  %s2263_s5 = inlined_call_operand.vmem [shape: f32[32,64], index: 5, kind: input, shape index: {}]   ;;  %s2264_s6 = inlined_call_operand.vmem [shape: f32[32,1], index: 6, kind: input, shape index: {}]   ;;  %s2265_s7 = inlined_call_operand.vmem [shape: f32[8,32], index: 7, kind: input, shape index: {}]   ;;  %s2266_s8 = inlined_call_operand.vmem [shape: f32[8,1], index: 8, kind: input, shape index: {}]   ;;  %s2267_s9 = inlined_call_operand.hbm [shape: f32[8,256], index: 9, kind: output, shape index: {}]  }
   0x1   :  { %16 = vsyncpa [#allocation3 + $0x1], 0  ;;  %s1731_s30 = smov 0   ;;  %s1733_s10 = smov 0  }
   0x2   :  { %s1735_s11 = smov 0   ;;  %s1737_s12 = smov 0  }
   0x3 LB: > { %s1752_s13 = sadd.s32 4294967295, %s1671_s12   ;;  %s1330_s14 = sadd.s32 4294967294, %s1671_s12   ;;  %s1671_s12 = sphi %s1737_s12, %s2273_s12   ;;  %s1667_s11 = sphi %s1735_s11, %s2272_s11   ;;  %s1663_s10 = sphi %s1733_s10, %s2271_s10   ;;  %s1659_s30 = sphi %s1731_s30, %s2270_s30  }
   0x4   : > { %s1756_s15 = sadd.s32 1, %s1671_s12   ;;  %s223_s16 = sadd.s32 1, %s1667_s11 }
   0x5   : > { %s220_s17 = ssub.s32 %s1671_s12, %s1756_s15  ;;  %p233_p0 = scmp.ne.s32.totalorder %s1667_s11, %s1663_s10 }
   0x6   : > { %p221_p1 = scmp.eq.s32.totalorder %s220_s17, 0  ;;  %p234_p2 = scmp.eq.s32.totalorder %s1752_s13, 1 }
   0x7   : > { %p239_p3 = scmp.ne.s32.totalorder %s1663_s10, %s1659_s30  ;;  %p240_p4 = scmp.eq.s32.totalorder %s1330_s14, 1 }
   0x8   : > { %s1767_s18 = scalar_select %p221_p1, %s1667_s11, %s223_s16  }
   0x9   : > { %p1769_p5 = por %p234_p2, %p233_p0  ;;  %p1773_p6 = por %p240_p4, %p239_p3 }
   0xa   : > { %p1333_p7 = scmp.ge.s32.totalorder %s1671_s12, 1  ;;  %p289_p8 = scmp.lt.s32.totalorder %s1671_s12, 3 }
   0xc   : > { %p290_p9 = pnand %p1333_p7, %p289_p8 }
   0xd   : > { %v332_v0 = vld [vmem:[%s2259_s1 + $0x20] sm:$0xff] (!%p290_p9)  ;;  %v1673_v2 = vmov (!%p290_p9), 1   ;;  %v329_v4 = vld [vmem:[%s2259_s1 + $0x8] sm:$0xff] (!%p290_p9)  ;;  %v1674_v6 = vmov (!%p290_p9), 2   ;;  %v330_v7 = vld [vmem:[%s2259_s1 + $0x10] sm:$0xff] (!%p290_p9)  ;;  %v1675_v8 = vmov (!%p290_p9), 0  }
   0xe   : > { %293 = sbr.rel (%p290_p9) target bundleno = 1083 (0x43b), region = 56  ;;  %v328_v1 = vld [vmem:[%s2259_s1] sm:$0xff] (!%p290_p9)  ;;  %1574 = vset.pattern.permute.xlu0 (!%p290_p9), %v1673_v2  ;;  %1567 = vset.pattern.permute.xlu1 (!%p290_p9), %v1673_v2  ;;  %v331_v9 = vld [vmem:[%s2259_s1 + $0x18] sm:$0xff] (!%p290_p9)  ;;  %v1676_v10 = vmov (!%p290_p9), 3   ;;  %v333_v11 = vld [vmem:[%s2259_s1 + $0x28] sm:$0xff] (!%p290_p9)  ;;  %p324_p10 = scmp.lt.s32.totalorder (!%p290_p9), %s1752_s13, 1 }
   0xf   : > { %463 = vperm.xlu0 (!%p290_p9), %1574, %v332_v0   ;;  %447 = vperm.xlu1 (!%p290_p9), %1567, %v328_v1   ;;  %v1790_v3 = vld [vmem:[%s2259_s1 + $0x40] sm:$0xff] (!%p290_p9)  ;;  %v335_v12 = vld [vmem:[%s2259_s1 + $0x38] sm:$0xff] (!%p290_p9)  ;;  %v749_v15 = vld [vmem:[%s2260_s2 + $0x8] sm:$0xff] (!%p290_p9)  ;;  %vm1073_vm0 = vcmask (!%p290_p9), 523264   ;;  %vm1678_vm1 = vmmov (!%p290_p9), 0   ;;  %vm1182_vm2 = vcmask (!%p290_p9), 261120  }
  0x10   : > { %v1799_v5 = vld [vmem:[%s2259_s1 + $0x60] sm:$0xff] (!%p290_p9)  ;;  %v1830_v13 = vld [vmem:[%s2259_s1 + $0x58] sm:$0xff] (!%p290_p9)  ;;  %v1844_v16 = vld [vmem:[%s2259_s1 + $0x70] sm:$0xff] (!%p290_p9)  ;;  %s321_s22 = sand.u32 (!%p290_p9), 1, %s1663_s10   ;;  %s1346_s24 = sshll.u32 (!%p290_p9), %s1752_s13, 7 }
  0x11   : > { %v748_v14 = vld [vmem:[%s2260_s2] sm:$0xff] (!%p290_p9)  ;;  %v334_v17 = vld [vmem:[%s2259_s1 + $0x30] sm:$0xff] (!%p290_p9)  ;;  %v751_v18 = vld [vmem:[%s2260_s2 + $0x18] sm:$0xff] (!%p290_p9)  ;;  %s1334_s23 = sshll.u32 (!%p290_p9), %s321_s22, 3  ;;  %s1258_s14 = scalar_lea.sflag (!%p290_p9), [#allocation3], %s321_s22 }
  0x12   : > { %v750_v19 = vld [vmem:[%s2260_s2 + $0x10] sm:$0xff] (!%p290_p9)  ;;  %v755_v20 = vld [vmem:[%s2260_s2 + $0x38] sm:$0xff] (!%p290_p9)  ;;  %v337_v22 = vld [vmem:[%s2259_s1 + $0x48] sm:$0xff] (!%p290_p9) }
  0x13   : > { %479 = vperm.xlu0 (!%p290_p9), %1574, %v1790_v3   ;;  %451 = vperm.xlu1 (!%p290_p9), %1567, %v329_v4   ;;  %v1872_v21 = vld [vmem:[%s2259_s1 + $0x78] sm:$0xff] (!%p290_p9)  ;;  %v761_v24 = vld [vmem:[%s2260_s2 + $0x68] sm:$0xff] (!%p290_p9)  ;;  %v884_v25 = vld [vmem:[%s2262_s4] sm:$0xff] (!%p290_p9) }
  0x14   : > { %v759_v23 = vld [vmem:[%s2260_s2 + $0x58] sm:$0xff] (!%p290_p9)  ;;  %v752_v26 = vld [vmem:[%s2260_s2 + $0x20] sm:$0xff] (!%p290_p9)  ;;  %v886_v27 = vld [vmem:[%s2262_s4 + $0x10] sm:$0xff] (!%p290_p9) }
  0x15   : > { %v753_v28 = vld [vmem:[%s2260_s2 + $0x28] sm:$0xff]  ;;  %v888_v29 = vld [vmem:[%s2262_s4 + $0x20] sm:$0xff]  ;;  %v890_v30 = vld [vmem:[%s2262_s4 + $0x30] sm:$0xff]  ;;  %s325_s25 = scalar_select %p324_p10, %s1752_s13, 1 }
  0x16   : > { %v1049_v33 = vld [vmem:[%s2264_s6] sm:$0xff]  ;;  %v338_v34 = vld [vmem:[%s2259_s1 + $0x50] sm:$0xff]  ;;  %v1967_v54 = vld [vmem:[%s2259_s1 + $0x68] sm:$0xff]  ;;  %s1680_s13 = smov [#allocation2]  }
  0x17   : > { %495 = vperm.xlu0 %1574, %v1799_v5   ;;  %1568 = vset.pattern.permute.xlu1 %v1674_v6  ;;  %v1051_v37 = vld [vmem:[%s2264_s6 + $0x10] sm:$0xff]  ;;  %v1176_v40 = vld [vmem:[%s2266_s8] sm:$0xff]  ;;  %s1335_s26 = sshll.u32 %s325_s25, 2  ;;  %s323_s25 = scalar_lea.vmem [#allocation2], %s1334_s23 }
  0x18   : > { %552 = vperm.xlu1 %1568, %v329_v4   ;;  %v754_v46 = vld [vmem:[%s2260_s2 + $0x30] sm:$0xff]  ;;  %s327_s29 = scalar_lea.vmem %s2258_s0, %s1335_s26  ;;  %s1271_s26 = sshll.u32 %s323_s25, 4  ;;  %s2218_s26 = int_to_ptr.vmem [resolvable:$true] %s1271_s26 }
  0x19   : > { %v1962_v53 = vld [vmem:[%s327_s29 + $0x1] ss:$0 sm:$0xff]  ;;  %v1970_v56 = vld [vmem:[%s327_s29 + $0x2] ss:$0 sm:$0xff]  ;;  %v1972_v57 = vld [vmem:[%s327_s29] ss:$0 sm:$0xff] }
  0x1a   : > { %v1980_v63 = vld [vmem:[%s327_s29 + $0x3] ss:$0 sm:$0xff]  ;;  %s2216_s29 = scalar_lea.hbm %s2267_s9, %s1346_s24  ;;  %s1609_s16 = scalar_lea.vmem %s2218_s26, 128 }
  0x1b   : > { %1595 = vset.pattern.permute.xlu0 %v1674_v6  ;;  %p1610_p11 = scmp.ne.s32.totalorder %s2218_s26, %s1609_s16  ;;  %s1613_s17 = sshll.u32 %s1680_s13, 4  ;;  %s1614_s17 = int_to_ptr.vmem [resolvable:$false] %s1613_s17 }
  0x1c   : > { %548 = vperm.xlu0 %1595, %v328_v1   ;;  %1569 = vset.pattern.permute.xlu1 %v1675_v8  ;;  %s1615_s21 = scalar_lea.vmem %s1614_s17, 256  ;;  %p1616_p0 = scmp.lt.s32.totalorder %s2218_s26, %s1614_s17 }
  0x1d   : > { %357 = vperm.xlu1 %1569, %v330_v7   ;;  %p1611_p12 = pnand %p1610_p11, %p1769_p5  ;;  %p1617_p1 = scmp.lt.s32.totalorder %s1615_s21, %s1609_s16 }
  0x1f   : > { %p1612_p13 = pneg %p1611_p12  ;;  %p1618_p2 = por %p1617_p1, %p1616_p0 }
  0x20   : > { %560 = vperm.xlu0 %1595, %v331_v9  }
  0x21   : > { %1570 = vset.pattern.permute.xlu1 %v1673_v2  ;;  %p1619_p3 = pnand %p1618_p2, %p1612_p13 }
  0x22   : > { %455 = vperm.xlu1 %1570, %v330_v7  }
  0x24   : > { %564 = vperm.xlu0 %1595, %v332_v0  }
  0x26   : > { %459 = vperm.xlu1 %1570, %v331_v9  }
  0x28   : > { %580 = vperm.xlu0 %1595, %v1790_v3  }
  0x2a   : > { %1571 = vset.pattern.permute.xlu1 %v1676_v10 }
  0x2b   : > { %653 = vperm.xlu1 %1571, %v329_v4  }
  0x2c   : > { %596 = vperm.xlu0 %1595, %v1799_v5  }
  0x2f   : > { %1572 = vset.pattern.permute.xlu1 %v1674_v6 }
  0x30   : > { %1599 = vset.pattern.permute.xlu0 %v1676_v10  ;;  %556 = vperm.xlu1 %1572, %v330_v7  }
  0x31   : > { %649 = vperm.xlu0 %1599, %v328_v1  }
  0x34   : > { %1573 = vset.pattern.permute.xlu1 %v1675_v8 }
  0x35   : > { %661 = vperm.xlu0 %1599, %v331_v9   ;;  %367 = vperm.xlu1 %1573, %v332_v0  }
  0x39   : > { %665 = vperm.xlu0 %1599, %v332_v0   ;;  %372 = vperm.xlu1 %1573, %v333_v11  }
  0x3d   : > { %677 = vperm.xlu0 %1599, %v335_v12   ;;  %1575 = vset.pattern.permute.xlu1 %v1673_v2 }
  0x3e   : > { %467 = vperm.xlu1 %1575, %v333_v11  }
  0x41   : > { %681 = vperm.xlu0 %1599, %v1790_v3  }
  0x42   : > { %1576 = vset.pattern.permute.xlu1 %v1676_v10 }
  0x43   : > { %657 = vperm.xlu1 %1576, %v330_v7  }
  0x45   : > { %693 = vperm.xlu0 %1599, %v1830_v13  }
  0x47   : > { %1577 = vset.pattern.permute.xlu1 %v1675_v8 }
  0x48   : > { %766 = vperm.xlu1 %1577, %v748_v14  }
  0x49   : > { %697 = vperm.xlu0 %1599, %v1799_v5  }
  0x4c   : > { %771 = vperm.xlu1 %1577, %v749_v15   ;;  %v757_v15 = vld [vmem:[%s2260_s2 + $0x48] sm:$0xff] }
  0x4d   : > { %705 = vperm.xlu0 %1599, %v1844_v16  }
  0x50   : > { %1578 = vset.pattern.permute.xlu1 %v1674_v6 }
  0x51   : > { %1606 = vset.pattern.permute.xlu0 %v1675_v8  ;;  %568 = vperm.xlu1 %1578, %v333_v11  }
  0x52   : > { %347 = vperm.xlu0 %1606, %v328_v1  }
  0x55   : > { %1579 = vset.pattern.permute.xlu1 %v1675_v8 }
  0x56   : > { %352 = vperm.xlu0 %1606, %v329_v4   ;;  %377 = vperm.xlu1 %1579, %v334_v17  }
  0x5a   : > { %362 = vperm.xlu0 %1606, %v331_v9   ;;  %1580 = vset.pattern.permute.xlu1 %v1673_v2 }
  0x5b   : > { %471 = vperm.xlu1 %1580, %v334_v17  }
  0x5e   : > { %382 = vperm.xlu0 %1606, %v335_v12  }
  0x5f   : > { %475 = vperm.xlu1 %1580, %v335_v12  }
  0x62   : > { %781 = vperm.xlu0 %1606, %v751_v18  }
  0x63   : > { %1581 = vset.pattern.permute.xlu1 %v1676_v10 }
  0x64   : > { %669 = vperm.xlu1 %1581, %v333_v11  }
  0x66   : > { %387 = vperm.xlu0 %1606, %v1790_v3  }
  0x68   : > { %1582 = vset.pattern.permute.xlu1 %v1675_v8 }
  0x69   : > { %776 = vperm.xlu1 %1582, %v750_v19  }
  0x6a   : > { %402 = vperm.xlu0 %1606, %v1830_v13  }
  0x6d   : > { %1583 = vset.pattern.permute.xlu1 %v1674_v6 }
  0x6e   : > { %572 = vperm.xlu1 %1583, %v334_v17   ;;  %801 = vperm.xlu0 %1606, %v755_v20  }
  0x72   : > { %576 = vperm.xlu1 %1583, %v335_v12   ;;  %407 = vperm.xlu0 %1606, %v1799_v5   ;;  %v756_v12 = vld [vmem:[%s2260_s2 + $0x40] sm:$0xff] }
  0x76   : > { %1584 = vset.pattern.permute.xlu1 %v1675_v8  ;;  %422 = vperm.xlu0 %1606, %v1872_v21  }
  0x77   : > { %392 = vperm.xlu1 %1584, %v337_v22  }
  0x7a   : > { %821 = vperm.xlu0 %1606, %v759_v23  }
  0x7b   : > { %1585 = vset.pattern.permute.xlu1 %v1673_v2 }
  0x7c   : > { %483 = vperm.xlu1 %1585, %v337_v22  }
  0x7e   : > { %831 = vperm.xlu0 %1606, %v761_v24  }
  0x80   : > { %1586 = vset.pattern.permute.xlu1 %v1676_v10 }
  0x81   : > { %673 = vperm.xlu1 %1586, %v334_v17  }
  0x82   : > { %894 = vperm.xlu0 %1606, %v884_v25  }
  0x85   : > { %1587 = vset.pattern.permute.xlu1 %v1675_v8 }
  0x86   : > { %786 = vperm.xlu1 %1587, %v752_v26   ;;  %904 = vperm.xlu0 %1606, %v886_v27  }
  0x8a   : > { %791 = vperm.xlu1 %1587, %v753_v28   ;;  %914 = vperm.xlu0 %1606, %v888_v29  }
  0x8e   : > { %1588 = vset.pattern.permute.xlu1 %v1674_v6  ;;  %v1907_v31 = vpop.permute.xlu1 %447  ;;  %v464_v32 = vpop.permute.xlu0 %463  ;;  %924 = vperm.xlu0 %1606, %v890_v30  }
  0x8f   : > { %584 = vperm.xlu1 %1588, %v337_v22   ;;  %v518_v55 = vmul.f32 %v1962_v53, %v464_v32  ;;  %v514_v24 = vmul.f32 %v1962_v53, %v1907_v31 }
  0x92   : > { %v1915_v35 = vpop.permute.xlu1 %451  ;;  %v1917_v36 = vpop.permute.xlu0 %479  ;;  %1055 = vperm.xlu0 %1606, %v1049_v33  }
  0x93   : > { %1589 = vset.pattern.permute.xlu1 %v1675_v8  ;;  %v515_v32 = vmul.f32 %v1962_v53, %v1915_v35 }
  0x94   : > { %397 = vperm.xlu1 %1589, %v338_v34  }
  0x96   : > { %v1923_v38 = vpop.permute.xlu0 %495  ;;  %1065 = vperm.xlu0 %1606, %v1051_v37  }
  0x97   : > { %v1925_v39 = vpop.permute.xlu1 %552 }
  0x98   : > { %1590 = vset.pattern.permute.xlu1 %v1673_v2  ;;  %v616_v31 = vmul.f32 %v1970_v56, %v1925_v39 }
  0x99   : > { %487 = vperm.xlu1 %1590, %v338_v34  }
  0x9a   : > { %1179 = vperm.xlu0 %1606, %v1176_v40  }
  0x9b   : > { %v1931_v41 = vpop.permute.xlu0 %548 }
  0x9c   : > { %v1933_v42 = vpop.permute.xlu1 %357  ;;  %v615_v25 = vmul.f32 %v1970_v56, %v1931_v41 }
  0x9d   : > { %491 = vperm.xlu1 %1590, %v1830_v13  }
  0x9f   : > { %v1936_v43 = vpop.permute.xlu0 %560 }
  0xa1   : > { %1591 = vset.pattern.permute.xlu1 %v1676_v10  ;;  %v1939_v44 = vpop.permute.xlu1 %455 }
  0xa2   : > { %685 = vperm.xlu1 %1591, %v337_v22  }
  0xa3   : > { %v565_v45 = vpop.permute.xlu0 %564 }
  0xa4   : > { %v619_v60 = vmul.f32 %v1970_v56, %v565_v45 }
  0xa5   : > { %v1945_v47 = vpop.permute.xlu1 %459 }
  0xa6   : > { %1592 = vset.pattern.permute.xlu1 %v1675_v8  ;;  %v517_v45 = vmul.f32 %v1962_v53, %v1945_v47 }
  0xa7   : > { %796 = vperm.xlu1 %1592, %v754_v46   ;;  %v1948_v48 = vpop.permute.xlu0 %580 }
  0xaa   : > { %v1951_v49 = vpop.permute.xlu1 %653 }
  0xab   : > { %1593 = vset.pattern.permute.xlu1 %v1674_v6  ;;  %v1954_v50 = vpop.permute.xlu0 %596  ;;  %v717_v46 = vmul.f32 %v1980_v63, %v1951_v49 }
  0xac   : > { %588 = vperm.xlu1 %1593, %v338_v34  }
  0xaf   : > { %v1959_v51 = vpop.permute.xlu1 %556 }
  0xb0   : > { %v650_v52 = vpop.permute.xlu0 %649  ;;  %592 = vperm.xlu1 %1593, %v1830_v13  }
  0xb1   : > { %v716_v27 = vmul.f32 %v1980_v63, %v650_v52 }
  0xb4   : > { %v1974_v58 = vpop.permute.xlu0 %661  ;;  %1594 = vset.pattern.permute.xlu1 %v1675_v8  ;;  %v368_v59 = vpop.permute.xlu1 %367 }
  0xb5   : > { %v433_v61 = vmul.f32 %v1972_v57, %v368_v59  ;;  %412 = vperm.xlu1 %1594, %v1967_v54  }
  0xb7   : > { %v534_v62 = vadd.f32 %v518_v55, %v433_v61 }
  0xb8   : > { %v666_v0 = vpop.permute.xlu0 %665  ;;  %v1982_v1 = vpop.permute.xlu1 %372 }
  0xb9   : > { %v720_v3 = vmul.f32 %v1980_v63, %v666_v0  ;;  %1596 = vset.pattern.permute.xlu1 %v1673_v2  ;;  %v635_v4 = vadd.f32 %v619_v60, %v534_v62 }
  0xba   : > { %499 = vperm.xlu1 %1596, %v1967_v54  }
  0xbb   : > { %v1987_v5 = vadd.f32 %v720_v3, %v635_v4  ;;  %v516_v4 = vmul.f32 %v1962_v53, %v1939_v44  ;;  %v758_v44 = vld [vmem:[%s2260_s2 + $0x50] sm:$0xff] }
  0xbc   : > { %v1989_v7 = vpop.permute.xlu0 %677 }
  0xbd   : > { %v1991_v9 = vpop.permute.xlu1 %467 }
  0xbe   : > { %1597 = vset.pattern.permute.xlu1 %v1676_v10 }
  0xbf   : > { %689 = vperm.xlu1 %1597, %v338_v34  }
  0xc0   : > { %v1994_v11 = vpop.permute.xlu0 %681 }
  0xc2   : > { %v658_v13 = vpop.permute.xlu1 %657 }
  0xc3   : > { %1598 = vset.pattern.permute.xlu1 %v1675_v8 }
  0xc4   : > { %806 = vperm.xlu1 %1598, %v756_v12   ;;  %v2000_v14 = vpop.permute.xlu0 %693 }
  0xc7   : > { %v767_v17 = vpop.permute.xlu1 %766 }
  0xc8   : > { %811 = vperm.xlu1 %1598, %v757_v15   ;;  %v2005_v18 = vpop.permute.xlu0 %697 }
  0xcb   : > { %v772_v19 = vpop.permute.xlu1 %771 }
  0xcc   : > { %1600 = vset.pattern.permute.xlu1 %v1674_v6  ;;  %v2008_v20 = vpop.permute.xlu0 %705 }
  0xcd   : > { %600 = vperm.xlu1 %1600, %v1967_v54  }
  0xd0   : > { %v2011_v22 = vpop.permute.xlu1 %568 }
  0xd1   : > { %v348_v23 = vpop.permute.xlu0 %347  ;;  %1601 = vset.pattern.permute.xlu1 %v1675_v8 }
  0xd2   : > { %v429_v26 = vmul.f32 %v1972_v57, %v348_v23  ;;  %417 = vperm.xlu1 %1601, %v1844_v16   ;;  %v431_v23 = vmul.f32 %v1972_v57, %v1933_v42 }
  0xd4   : > { %v530_v28 = vadd.f32 %v514_v24, %v429_v26  ;;  %v617_v24 = vmul.f32 %v1970_v56, %v1959_v51  ;;  %v718_v26 = vmul.f32 %v1980_v63, %v658_v13  ;;  %v724_v13 = vmul.f32 %v1980_v63, %v1994_v11 }
  0xd5   : > { %v353_v29 = vpop.permute.xlu0 %352  ;;  %v378_v30 = vpop.permute.xlu1 %377 }
  0xd6   : > { %v631_v33 = vadd.f32 %v615_v25, %v530_v28  ;;  %v430_v34 = vmul.f32 %v1972_v57, %v353_v29  ;;  %1602 = vset.pattern.permute.xlu1 %v1673_v2  ;;  %v618_v2 = vmul.f32 %v1970_v56, %v1936_v43  ;;  %v435_v59 = vmul.f32 %v1972_v57, %v378_v30 }
  0xd7   : > { %503 = vperm.xlu1 %1602, %v1844_v16   ;;  %v719_v43 = vmul.f32 %v1980_v63, %v1974_v58  ;;  %v532_v58 = vadd.f32 %v516_v4, %v431_v23  ;;  %v623_v29 = vmul.f32 %v1970_v56, %v1948_v48 }
  0xd8   : > { %v531_v37 = vadd.f32 %v515_v32, %v430_v34  ;;  %v732_v40 = vadd.f32 %v716_v27, %v631_v33 }
  0xd9   : > { %v363_v41 = vpop.permute.xlu0 %362  ;;  %v633_v42 = vadd.f32 %v617_v24, %v532_v58 }
  0xda   : > { %v632_v35 = vadd.f32 %v616_v31, %v531_v37  ;;  %v432_v52 = vmul.f32 %v1972_v57, %v363_v41  ;;  %v472_v55 = vpop.permute.xlu1 %471  ;;  %v844_v62 = vadd.f32 %v767_v17, %v732_v40 }
  0xdb   : > { %v520_v39 = vmul.f32 %v1962_v53, %v472_v55  ;;  %507 = vperm.xlu1 %1602, %v1872_v21   ;;  %v734_v33 = vadd.f32 %v718_v26, %v633_v42  ;;  %v889_v26 = vld [vmem:[%s2262_s4 + $0x28] sm:$0xff]  ;;  %v891_v42 = vld [vmem:[%s2262_s4 + $0x38] sm:$0xff] }
  0xdc   : > { %v533_v60 = vadd.f32 %v517_v45, %v432_v52  ;;  %v733_v61 = vadd.f32 %v717_v46, %v632_v35  ;;  %v860_v15 = vmax.f32 %v844_v62, 0.0 }
  0xdd   : > { %v2038_v47 = vadd.f32 %v520_v39, %v435_v59  ;;  %v2040_v0 = vpop.permute.xlu0 %382  ;;  %v728_v59 = vmul.f32 %v1980_v63, %v2005_v18 }
  0xde   : > { %v2042_v49 = vpop.permute.xlu1 %475  ;;  %v845_v3 = vadd.f32 %v772_v19, %v733_v61  ;;  %v634_v12 = vadd.f32 %v618_v2, %v533_v60 }
  0xdf   : > { %1603 = vset.pattern.permute.xlu1 %v1676_v10 }
  0xe0   : > { %701 = vperm.xlu1 %1603, %v1967_v54   ;;  %v861_v17 = vmax.f32 %v845_v3, 0.0  ;;  %v735_v27 = vadd.f32 %v719_v43, %v634_v12  ;;  %v522_v54 = vmul.f32 %v1962_v53, %v1917_v36  ;;  %v763_v3 = vld [vmem:[%s2260_s2 + $0x78] sm:$0xff]  ;;  %v885_v12 = vld [vmem:[%s2262_s4 + $0x8] sm:$0xff] }
  0xe1   : > { %v782_v19 = vpop.permute.xlu0 %781 }
  0xe2   : > { %v1467_v25 = vpack.c.bf16 %v861_v17, %v860_v15  ;;  %v847_v32 = vadd.f32 %v782_v19, %v735_v27  ;;  %v434_v15 = vmul.f32 %v1972_v57, %v1982_v1  ;;  %v620_v17 = vmul.f32 %v1970_v56, %v2011_v22 }
  0xe3   : > { %v670_v28 = vpop.permute.xlu1 %669 }
  0xe4   : > { %1604 = vset.pattern.permute.xlu1 %v1675_v8  ;;  %1468 = vmatprep.subr.bf16.mxu0 %v1467_v25  ;;  %v863_v41 = vmax.f32 %v847_v32, 0.0  ;;  %v721_v24 = vmul.f32 %v1980_v63, %v670_v28  ;;  %v1052_v32 = vld [vmem:[%s2264_s6 + $0x18] sm:$0xff] }
  0xe5   : > { %816 = vperm.xlu1 %1604, %v758_v44   ;;  %1470 = vmatpush3.bf16.msra.mxu0 %v1467_v25  ;;  %v388_v51 = vpop.permute.xlu0 %387  ;;  %v876_v44 = vld [vmem:[%s2261_s3] sm:$0xff] }
  0xe6   : > { %v437_v30 = vmul.f32 %v1972_v57, %v388_v51  ;;  %1422 = vmatprep.mubr.f32.mxu0 %v876_v44 }
  0xe8   : > { %v777_v34 = vpop.permute.xlu1 %776  ;;  %v538_v31 = vadd.f32 %v522_v54, %v437_v30 }
  0xe9   : > { %v846_v36 = vadd.f32 %v777_v34, %v734_v33  ;;  %1605 = vset.pattern.permute.xlu1 %v1674_v6  ;;  %v2067_v37 = vpop.permute.xlu0 %402  ;;  %v526_v6 = vmul.f32 %v1962_v53, %v1923_v38  ;;  %v760_v38 = vld [vmem:[%s2260_s2 + $0x60] sm:$0xff]  ;;  %v436_v33 = vmul.f32 %v1972_v57, %v2040_v0 }
  0xea   : > { %604 = vperm.xlu1 %1605, %v1844_v16   ;;  %v639_v40 = vadd.f32 %v623_v29, %v538_v31  ;;  %v627_v16 = vmul.f32 %v1970_v56, %v1954_v50 }
  0xeb   : > { %v862_v45 = vmax.f32 %v846_v36, 0.0 }
  0xec   : > { %v2070_v48 = vadd.f32 %v724_v13, %v639_v40  ;;  %v521_v13 = vmul.f32 %v1962_v53, %v2042_v49 }
  0xed   : > { %v1471_v46 = vpack.c.bf16 %v863_v41, %v862_v45  ;;  %v2072_v35 = vpop.permute.xlu1 %572  ;;  %v2074_v52 = vpop.permute.xlu0 %801 }
  0xee   : > { %608 = vperm.xlu1 %1605, %v1872_v21   ;;  %v537_v41 = vadd.f32 %v521_v13, %v436_v33  ;;  %v621_v0 = vmul.f32 %v1970_v56, %v2072_v35 }
  0xef   : > { %1472 = vmatprep.subr.bf16.mxu0 %v1471_v46 }
  0xf0   : > { %1474 = vmatpush3.bf16.msra.mxu0 %v1471_v46 }
  0xf1   : > { %v577_v11 = vpop.permute.xlu1 %576  ;;  %v408_v55 = vpop.permute.xlu0 %407 }
  0xf2   : > { %1607 = vset.pattern.permute.xlu1 %v1676_v10  ;;  %v441_v2 = vmul.f32 %v1972_v57, %v408_v55  ;;  %v762_v10 = vld [vmem:[%s2260_s2 + $0x70] sm:$0xff]  ;;  %v622_v31 = vmul.f32 %v1970_v56, %v577_v11  ;;  %v637_v11 = vadd.f32 %v621_v0, %v2038_v47 }
  0xf3   : > { %709 = vperm.xlu1 %1607, %v1872_v21  }
  0xf4   : > { %v542_v39 = vadd.f32 %v526_v6, %v441_v2  ;;  %v723_v6 = vmul.f32 %v1980_v63, %v1989_v7  ;;  %v638_v55 = vadd.f32 %v622_v31, %v537_v41 }
  0xf6   : > { %v393_v60 = vpop.permute.xlu1 %392  ;;  %v643_v61 = vadd.f32 %v627_v16, %v542_v39  ;;  %v739_v16 = vadd.f32 %v723_v6, %v638_v55 }
  0xf7   : > { %1608 = vset.pattern.permute.xlu1 %v1675_v8  ;;  %v438_v62 = vmul.f32 %v1972_v57, %v393_v60  ;;  %v519_v8 = vmul.f32 %v1962_v53, %v1991_v9  ;;  %v887_v9 = vld [vmem:[%s2262_s4 + $0x18] sm:$0xff] }
  0xf8   : > { %826 = vperm.xlu1 %1608, %v760_v38   ;;  %v2090_v50 = vadd.f32 %v728_v59, %v643_v61  ;;  %v851_v59 = vadd.f32 %v2074_v52, %v739_v16 }
  0xf9   : > { %v535_v23 = vadd.f32 %v519_v8, %v434_v15 }
  0xfa   : > { %v867_v61 = vmax.f32 %v851_v59, 0.0 }
  0xfb   : > { %v484_v21 = vpop.permute.xlu1 %483  ;;  %v636_v25 = vadd.f32 %v620_v17, %v535_v23 }
  0xfc   : > { %v523_v18 = vmul.f32 %v1962_v53, %v484_v21  ;;  %836 = vperm.xlu1 %1608, %v762_v10  }
  0xfd   : > { %v737_v1 = vadd.f32 %v721_v24, %v636_v25 }
  0xfe   : > { %v2100_v4 = vadd.f32 %v523_v18, %v438_v62 }
 0x100   : > { %841 = vperm.xlu1 %1608, %v763_v3   ;;  %v674_v43 = vpop.permute.xlu1 %673 }
 0x101   : > { %v722_v49 = vmul.f32 %v1980_v63, %v674_v43 }
 0x103   : > { %v738_v39 = vadd.f32 %v722_v49, %v637_v11 }
 0x104   : > { %899 = vperm.xlu1 %1608, %v885_v12  }
 0x105   : > { %v787_v19 = vpop.permute.xlu1 %786 }
 0x106   : > { %v848_v58 = vadd.f32 %v787_v19, %v1987_v5  ;;  %v1050_v5 = vld [vmem:[%s2264_s6 + $0x8] sm:$0xff] }
 0x108   : > { %909 = vperm.xlu1 %1608, %v887_v9   ;;  %v864_v28 = vmax.f32 %v848_v58, 0.0  ;;  %v440_v58 = vmul.f32 %v1972_v57, %v2067_v37 }
 0x109   : > { %v792_v22 = vpop.permute.xlu1 %791 }
 0x10a   : > { %v849_v27 = vadd.f32 %v792_v22, %v737_v1 }
 0x10c   : > { %v865_v54 = vmax.f32 %v849_v27, 0.0  ;;  %919 = vperm.xlu1 %1608, %v889_v26  }
 0x10e   : > { %v1475_v51 = vpack.c.bf16 %v865_v54, %v864_v28  ;;  %v585_v29 = vpop.permute.xlu1 %584  ;;  %v423_v28 = vpop.permute.xlu0 %422  ;;  %v727_v54 = vmul.f32 %v1980_v63, %v2000_v14 }
 0x10f   : > { %v624_v8 = vmul.f32 %v1970_v56, %v585_v29 }
 0x110   : > { %929 = vperm.xlu1 %1608, %v891_v42   ;;  %1476 = vmatprep.subr.bf16.mxu0 %v1475_v51 }
 0x111   : > { %1478 = vmatpush3.bf16.msra.mxu0 %v1475_v51  ;;  %v640_v52 = vadd.f32 %v624_v8, %v2100_v4 }
 0x112   : > { %v822_v37 = vpop.permute.xlu0 %821 }
 0x113   : > { %v398_v30 = vpop.permute.xlu1 %397 }
 0x114   : > { %1060 = vperm.xlu1 %1608, %v1050_v5   ;;  %v439_v36 = vmul.f32 %v1972_v57, %v398_v30 }
 0x118   : > { %1070 = vperm.xlu1 %1608, %v1052_v32   ;;  %v488_v34 = vpop.permute.xlu1 %487 }
 0x119   : > { %v524_v40 = vmul.f32 %v1962_v53, %v488_v34 }
 0x11b   : > { %v540_v45 = vadd.f32 %v524_v40, %v439_v36 }
 0x11c   : > { %v492_v46 = vpop.permute.xlu1 %491 }
 0x11d   : > { %v525_v1 = vmul.f32 %v1962_v53, %v492_v46 }
 0x11f   : > { %v541_v26 = vadd.f32 %v525_v1, %v440_v58  ;;  %v881_v58 = vld [vmem:[%s2261_s3 + $0x28] sm:$0xff]  ;;  %v882_v1 = vld [vmem:[%s2261_s3 + $0x30] sm:$0xff] }
 0x121   : > { %v686_v2 = vpop.permute.xlu1 %685 }
 0x122   : > { %v725_v43 = vmul.f32 %v1980_v63, %v686_v2 }
 0x124   : > { %v741_v15 = vadd.f32 %v725_v43, %v640_v52 }
 0x126   : > { %v797_v38 = vpop.permute.xlu1 %796 }
 0x127   : > { %v850_v60 = vadd.f32 %v797_v38, %v738_v39  ;;  %v832_v38 = vpop.permute.xlu0 %831 }
 0x129   : > { %v866_v10 = vmax.f32 %v850_v60, 0.0 }
 0x12b   : > { %v1479_v21 = vpack.c.bf16 %v867_v61, %v866_v10  ;;  %v589_v62 = vpop.permute.xlu1 %588 }
 0x12c   : > { %v625_v42 = vmul.f32 %v1970_v56, %v589_v62  ;;  %v444_v62 = vmul.f32 %v1972_v57, %v423_v28 }
 0x12d   : > { %1480 = vmatprep.subr.bf16.mxu0 %v1479_v21 }
 0x12e   : > { %1482 = vmatpush3.bf16.msra.mxu0 %v1479_v21  ;;  %v641_v30 = vadd.f32 %v625_v42, %v540_v45 }
 0x12f   : > { %v593_v7 = vpop.permute.xlu1 %592 }
 0x130   : > { %v626_v4 = vmul.f32 %v1970_v56, %v593_v7 }
 0x132   : > { %v642_v27 = vadd.f32 %v626_v4, %v541_v26  ;;  %v1045_v4 = vld [vmem:[%s2263_s5] sm:$0xff] }
 0x133   : > { %1450 = vmatprep.mubr.msk.f32.mxu1 %vm1073_vm0, %v1045_v4 }
 0x134   : > { %v413_v18 = vpop.permute.xlu1 %412  ;;  %v743_v51 = vadd.f32 %v727_v54, %v642_v27 }
 0x135   : > { %v442_v14 = vmul.f32 %v1972_v57, %v413_v18 }
 0x136   : > { %v855_v33 = vadd.f32 %v822_v37, %v743_v51 }
 0x138   : > { %v871_v36 = vmax.f32 %v855_v33, 0.0 }
 0x139   : > { %v500_v35 = vpop.permute.xlu1 %499 }
 0x13a   : > { %v527_v46 = vmul.f32 %v1962_v53, %v500_v35 }
 0x13c   : > { %v543_v0 = vadd.f32 %v527_v46, %v442_v14 }
 0x13e   : > { %v690_v3 = vpop.permute.xlu1 %689 }
 0x13f   : > { %v726_v29 = vmul.f32 %v1980_v63, %v690_v3  ;;  %v730_v3 = vmul.f32 %v1980_v63, %v2008_v20  ;;  %v878_v20 = vld [vmem:[%s2261_s3 + $0x10] sm:$0xff] }
 0x141   : > { %v742_v32 = vadd.f32 %v726_v29, %v641_v30 }
 0x143   : > { %v807_v47 = vpop.permute.xlu1 %806 }
 0x144   : > { %v852_v12 = vadd.f32 %v807_v47, %v2070_v48 }
 0x146   : > { %v868_v24 = vmax.f32 %v852_v12, 0.0 }
 0x147   : > { %v812_v17 = vpop.permute.xlu1 %811 }
 0x148   : > { %v853_v23 = vadd.f32 %v812_v17, %v741_v15 }
 0x14a   : > { %v869_v19 = vmax.f32 %v853_v23, 0.0 }
 0x14c   : > { %v1483_v9 = vpack.c.bf16 %v869_v19, %v868_v24  ;;  %v601_v25 = vpop.permute.xlu1 %600 }
 0x14d   : > { %v628_v6 = vmul.f32 %v1970_v56, %v601_v25  ;;  %v879_v25 = vld [vmem:[%s2261_s3 + $0x18] sm:$0xff] }
 0x14e   : > { %1484 = vmatprep.subr.bf16.mxu0 %v1483_v9 }
 0x14f   : > { %1486 = vmatpush3.bf16.msra.mxu0 %v1483_v9  ;;  %v644_v16 = vadd.f32 %v628_v6, %v543_v0 }
 0x151   : > { %v418_v44 = vpop.permute.xlu1 %417 }
 0x152   : > { %v443_v59 = vmul.f32 %v1972_v57, %v418_v44  ;;  %v880_v44 = vld [vmem:[%s2261_s3 + $0x20] sm:$0xff] }
 0x156   : > { %v504_v22 = vpop.permute.xlu1 %503 }
 0x157   : > { %v528_v49 = vmul.f32 %v1962_v53, %v504_v22  ;;  %v883_v22 = vld [vmem:[%s2261_s3 + $0x38] sm:$0xff] }
 0x159   : > { %v544_v60 = vadd.f32 %v528_v49, %v443_v59 }
 0x15a   : > { %v508_v48 = vpop.permute.xlu1 %507 }
 0x15b   : > { %v529_v61 = vmul.f32 %v1962_v53, %v508_v48  ;;  %v895_v48 = vpop.permute.xlu0 %894 }
 0x15d   : > { %v545_v8 = vadd.f32 %v529_v61, %v444_v62  ;;  %v1046_v62 = vld [vmem:[%s2263_s5 + $0x8] sm:$0xff] }
 0x15f   : > { %v702_v5 = vpop.permute.xlu1 %701  ;;  %v905_v54 = vpop.permute.xlu0 %904 }
 0x160   : > { %v729_v45 = vmul.f32 %v1980_v63, %v702_v5 }
 0x162   : > { %v745_v2 = vadd.f32 %v729_v45, %v644_v16 }
 0x164   : > { %v817_v13 = vpop.permute.xlu1 %816  ;;  %v857_v10 = vadd.f32 %v832_v38, %v745_v2 }
 0x165   : > { %v854_v34 = vadd.f32 %v817_v13, %v742_v32 }
 0x166   : > { %v873_v52 = vmax.f32 %v857_v10, 0.0 }
 0x167   : > { %v870_v31 = vmax.f32 %v854_v34, 0.0 }
 0x169   : > { %v1487_v40 = vpack.c.bf16 %v871_v36, %v870_v31  ;;  %v605_v41 = vpop.permute.xlu1 %604  ;;  %v915_v36 = vpop.permute.xlu0 %914 }
 0x16a   : > { %v629_v39 = vmul.f32 %v1970_v56, %v605_v41 }
 0x16b   : > { %1488 = vmatprep.subr.bf16.mxu0 %v1487_v40 }
 0x16c   : > { %1490 = vmatpush3.bf16.msra.mxu0 %v1487_v40  ;;  %v645_v7 = vadd.f32 %v629_v39, %v544_v60 }
 0x16d   : > { %v609_v55 = vpop.permute.xlu1 %608 }
 0x16e   : > { %v630_v18 = vmul.f32 %v1970_v56, %v609_v55  ;;  %v746_v17 = vadd.f32 %v730_v3, %v645_v7  ;;  %v1047_v7 = vld [vmem:[%s2263_s5 + $0x10] sm:$0xff]  ;;  %v1679_v3 = vmov 0.0  }
 0x170   : > { %v646_v15 = vadd.f32 %v630_v18, %v545_v8  ;;  %v1048_v18 = vld [vmem:[%s2263_s5 + $0x18] sm:$0xff] }
 0x172   : > { %v710_v11 = vpop.permute.xlu1 %709 }
 0x173   : > { %v731_v43 = vmul.f32 %v1980_v63, %v710_v11  ;;  %v877_v63 = vld [vmem:[%s2261_s3 + $0x8] sm:$0xff]  ;;  %v925_v11 = vpop.permute.xlu0 %924 }
 0x175   : > { %v747_v57 = vadd.f32 %v731_v43, %v646_v15 }
 0x177   : > { %v827_v21 = vpop.permute.xlu1 %826  ;;  %v1056_v43 = vpop.permute.xlu0 %1055 }
 0x178   : > { %v856_v35 = vadd.f32 %v827_v21, %v2090_v50 }
 0x17a   : > { %v872_v47 = vmax.f32 %v856_v35, 0.0  ;;  %v1677_v35 = vmov 0.0|0.0  }
 0x17b   : > { %v837_v12 = vpop.permute.xlu1 %836 }
 0x17c   : > { %v1491_v53 = vpack.c.bf16 %v873_v52, %v872_v47  ;;  %v858_v23 = vadd.f32 %v837_v12, %v746_v17 }
 0x17e   : > { %1492 = vmatprep.subr.bf16.mxu0 %v1491_v53  ;;  %v874_v19 = vmax.f32 %v858_v23, 0.0 }
 0x17f   : > { %v842_v24 = vpop.permute.xlu1 %841  ;;  %1494 = vmatpush3.bf16.msra.mxu0 %v1491_v53 }
 0x180   : > { %v859_v56 = vadd.f32 %v842_v24, %v747_v57  ;;  %v1066_v24 = vpop.permute.xlu0 %1065 }
 0x182   : > { %v875_v50 = vmax.f32 %v859_v56, 0.0 }
 0x183   : > { %v900_v26 = vpop.permute.xlu1 %899 }
 0x184   : > { %v1495_v9 = vpack.c.bf16 %v875_v50, %v874_v19 }
 0x186   : > { %1496 = vmatprep.subr.bf16.mxu0 %v1495_v9 }
 0x187   : > { %1498 = vmatpush3.bf16.msra.mxu0 %v1495_v9  ;;  %v910_v27 = vpop.permute.xlu1 %909 }
 0x18a   : > { %1423 = vmatmul.mubr.f32.vlgmr.msra.gmra.mrb[0].mxu0 %v877_v63 }
 0x18b   : > { %1425 = vmatprep.mubr.f32.mxu0 %v878_v20  ;;  %v920_v13 = vpop.permute.xlu1 %919 }
 0x18e   : > { %1426 = vmatmul.mubr.f32.gmra.mrb[2].mxu0 %v879_v25 }
 0x18f   : > { %1428 = vmatprep.mubr.f32.mxu0 %v880_v44  ;;  %v930_v16 = vpop.permute.xlu1 %929  ;;  %v1175_v44 = vld [vmem:[%s2265_s7] sm:$0xff] }
 0x192   : > { %1429 = vmatmul.mubr.f32.gmra.mrb[4].mxu0 %v881_v58  ;;  %v1180_v58 = vpop.permute.xlu0 %1179 }
 0x193   : > { %1431 = vmatprep.mubr.f32.mxu0 %v882_v1  ;;  %v1061_v8 = vpop.permute.xlu1 %1060 }
 0x196   : > { %1432 = vmatmul.mubr.f32.gmra.mrb[6].mxu0 %v883_v22 }
 0x197   : > { %v1071_v17 = vpop.permute.xlu1 %1070 }
 0x25d   : > { %v1424_v28 = vpop.f32.mrb[0].mxu0 }
 0x25e   : > { %v1004_v42 = vadd.f32 %v1424_v28, %v900_v26  ;;  %v998_v51 = vpop.f32.mrb[1].mxu0 }
 0x25f   : > { %v999_v29 = vadd.f32 %v998_v51, %v895_v48 }
 0x260   : > { %v1038_v5 = vmax.f32 %v1004_v42, 0.0 }
 0x261   : > { %v1037_v30 = vmax.f32 %v999_v29, 0.0  ;;  %v1427_v37 = vpop.f32.mrb[2].mxu0 }
 0x262   : > { %v1014_v32 = vadd.f32 %v1427_v37, %v910_v27  ;;  %v1008_v33 = vpop.f32.mrb[3].mxu0 }
 0x263   : > { %v1009_v34 = vadd.f32 %v1008_v33, %v905_v54  ;;  %v1499_v31 = vpack.c.bf16 %v1038_v5, %v1037_v30 }
 0x264   : > { %v1040_v40 = vmax.f32 %v1014_v32, 0.0 }
 0x265   : > { %v1039_v41 = vmax.f32 %v1009_v34, 0.0  ;;  %v1430_v46 = vpop.f32.mrb[4].mxu0  ;;  %1500 = vmatprep.subr.bf16.mxu1 %v1499_v31 }
 0x266   : > { %v1024_v14 = vadd.f32 %v1430_v46, %v920_v13  ;;  %v1018_v6 = vpop.f32.mrb[5].mxu0  ;;  %1502 = vmatpush3.bf16.msra.mxu1 %v1499_v31 }
 0x267   : > { %v1503_v55 = vpack.c.bf16 %v1040_v40, %v1039_v41  ;;  %v1019_v0 = vadd.f32 %v1018_v6, %v915_v36 }
 0x268   : > { %v1042_v45 = vmax.f32 %v1024_v14, 0.0 }
 0x269   : > { %v1041_v49 = vmax.f32 %v1019_v0, 0.0  ;;  %v1433_v2 = vpop.f32.mrb[6].mxu0  ;;  %1504 = vmatprep.subr.bf16.mxu1 %v1503_v55 }
 0x26a   : > { %v1034_v59 = vadd.f32 %v1433_v2, %v930_v16  ;;  %v1028_v39 = vpop.f32.mrb[7].mxu0  ;;  %1506 = vmatpush3.bf16.msra.mxu1 %v1503_v55 }
 0x26b   : > { %v1507_v38 = vpack.c.bf16 %v1042_v45, %v1041_v49  ;;  %v1029_v60 = vadd.f32 %v1028_v39, %v925_v11 }
 0x26c   : > { %v1044_v61 = vmax.f32 %v1034_v59, 0.0 }
 0x26d   : > { %v1043_v10 = vmax.f32 %v1029_v60, 0.0  ;;  %1508 = vmatprep.subr.bf16.mxu1 %v1507_v38 }
 0x26e   : > { %1510 = vmatpush3.bf16.msra.mxu1 %v1507_v38 }
 0x26f   : > { %v1511_v21 = vpack.c.bf16 %v1044_v61, %v1043_v10 }
 0x271   : > { %1512 = vmatprep.subr.bf16.mxu1 %v1511_v21 }
 0x272   : > { %1514 = vmatpush3.bf16.msra.mxu1 %v1511_v21 }
 0x273   : > { %1515 = vmatprep.subr.bf16.mxu1 %v1677_v35 }
 0x275   : > { %1451 = vmatmul.mubr.msk.f32.vlgmr.msra.gmra.mrb[0].mxu1 %vm1073_vm0, %v1046_v62 }
 0x276   : > { %1453 = vmatprep.mubr.msk.f32.mxu1 %vm1073_vm0, %v1047_v7 }
 0x279   : > { %1454 = vmatmul.mubr.msk.f32.gmra.mrb[2].mxu1 %vm1073_vm0, %v1048_v18 }
 0x27a   : > { %1464 = vmatprep.mubr.msk.f32.mxu1 %vm1678_vm1, %v1679_v3 }
 0x348   : > { %v1452_v47 = vpop.f32.mrb[0].mxu1 }
 0x349   : > { %v1158_v52 = vadd.f32 %v1452_v47, %v1061_v8  ;;  %v1152_v12 = vpop.f32.mrb[1].mxu1 }
 0x34a   : > { %v1153_v15 = vadd.f32 %v1152_v12, %v1056_v43 }
 0x34b   : > { %v1172_v53 = vmax.f32 %v1158_v52, 0.0 }
 0x34c   : > { %v1171_v23 = vmax.f32 %v1153_v15, 0.0  ;;  %v1455_v57 = vpop.f32.mrb[2].mxu1 }
 0x34d   : > { %v1168_v56 = vadd.f32 %v1455_v57, %v1071_v17  ;;  %v1162_v19 = vpop.f32.mrb[3].mxu1 }
 0x34e   : > { %v1516_v50 = vpack.c.bf16 %v1172_v53, %v1171_v23  ;;  %v1163_v9 = vadd.f32 %v1162_v19, %v1066_v24 }
 0x34f   : > { %v1174_v63 = vmax.f32 %v1168_v56, 0.0 }
 0x350   : > { %v1173_v20 = vmax.f32 %v1163_v9, 0.0  ;;  %1517 = vmatpush3.bf16.msra.mxu1 %v1516_v50 }
 0x351   : > { %1518 = vmatprep.subr.bf16.mxu1 %v1677_v35 }
 0x352   : > { %v1519_v25 = vpack.c.bf16 %v1174_v63, %v1173_v20 }
 0x354   : > { %1520 = vmatpush3.bf16.msra.mxu1 %v1519_v25 }
 0x357   : > { %1465 = vmatmul.mubr.msk.f32.vlgmr.msra.gmra.mrb[4].mxu1 %vm1182_vm2, %v1175_v44 }
 0x42a   : > { %v1252_v1 = vpop.f32.mrb[4].mxu1 }
 0x42b   : > { %v1253_v22 = vadd.f32 %v1252_v1, %v1180_v58  ;;  %v1466_v4 = vpop.f32.mrb[5].mxu1 }
 0x42d   : > { %1256 = vst [vmem:[%s323_s25] sm:$0xff] %v1253_v22 }
 0x42e   : > { %1622 = shalt.err (!%p1619_p3)
}
 0x42f   : > { %s1623_s22 = scalar_lea.hbm %s2216_s29, 128  ;;  %s1627_s25 = scalar_lea.hbm %s2267_s9, 256 }
 0x430   : > { %p1624_p4 = scmp.ne.s32.totalorder %s2216_s29, %s1623_s22  ;;  %p1628_p9 = scmp.lt.u32.totalorder %s2216_s29, %s2267_s9 }
 0x431   : > { %p1629_p10 = scmp.lt.u32.totalorder %s1627_s25, %s1623_s22  ;;  %p1631_p12 = scmp.lt.u32.totalorder %s1623_s22, %s2216_s29 }
 0x432   : > { %p1625_p7 = pnand %p1624_p4, %p1769_p5 }
 0x433   : > { %p1630_p11 = por %p1629_p10, %p1628_p9 }
 0x434   : > { %p1626_p8 = pneg %p1625_p7 }
 0x435   : > { %p1632_p13 = por %p1631_p12, %p1630_p11 }
 0x437   : > { %p1633_p0 = pnand %p1632_p13, %p1626_p8 }
 0x439   : > { %1636 = shalt.err (!%p1633_p0)
}
 0x43a   : > { %1521 = dma.vmem_to_hbm [thread:$0]  (%p1769_p5), %s2218_s26, 128, %s2216_s29, %s1258_s14  }
 0x43b PF: > { %p1527_p1 = scmp.ge.s32.totalorder %s1671_s12, 2  ;;  %s1283_s16 = sand.u32 1, %s1659_s30  }
 0x43c   : > { %s1284_s13 = scalar_lea.sflag [#allocation3], %s1283_s16 }
 0x43d   : > { %p1524_p2 = pnand %p1527_p1, %p1773_p6 }
 0x43f   : > { %1654 = dma.done.wait (!%p1524_p2), %s1284_s13, 128  }
 0x440   : > { %1656 = vsyncadd (!%p1524_p2), %s1284_s13, 4294967168  ;;  %p19_p3 = scmp.ge.s32.totalorder %s1756_s15, 4   ;;  %s2270_s30 = smov %s1663_s10 }
 0x441   : > { %s2271_s10 = smov %s1667_s11  ;;  %s2272_s11 = smov %s1767_s18 }
 0x442   : > { %s2273_s12 = smov %s1756_s15  ;;  %21 = sbr.rel (!%p19_p3) target bundleno = 3 (0x3), region = 91 }
 0x449   :  { %1289 = vsyncpa [#allocation3], 1 }
 0x44a   :  { %1291 = vsyncpa [#allocation3 + $0x1], 1 }

</bundles_post_ra>
